<compile_context>
chip_gen: v5e
topology: v5e:2x2
jax: 0.10.0
libtpu: 0.0.40
codegen_flags: <defaults>
</compile_context>

<pallas_src>
import jax
import jax.numpy as jnp
from jax.experimental import pallas as pl
from jax.experimental.pallas import tpu as pltpu

BN_EPS = 1e-5


def _round_up(n, m):
    return ((n + m - 1) // m) * m


def _graphconv_kernel(x_ref, w_ref, scale_ref, shift_ref, o_ref):
    # x_ref     : (TB, J*Cin)        batch tile, lane-dense
    # w_ref     : (J*Cin, J*Cout)    folded graph-conv operator (resident)
    # scale_ref : (1, J*Cout)        folded BN scale, tiled over joints
    # shift_ref : (1, J*Cout)        folded bias + BN shift, tiled over joints
    # o_ref     : (TB, J*Cout)
    y = jnp.dot(x_ref[...], w_ref[...], preferred_element_type=jnp.float32)
    y = y * scale_ref[...] + shift_ref[...]
    o_ref[...] = jnp.maximum(y, 0.0).astype(o_ref.dtype)


def fold_params(W, adjs, lamdas, bias, bn):
    """Fold all grid-invariant parameter math into one matmul operator + scale/shift.

    W      : (2, Cin, Cout)
    adjs   : (3, J, J)    adjacency buffers with the 1e-6 affinity modulation added
    lamdas : (3, J, Cout) Lamda1..3
    bias   : (Cout,)
    bn     : (gamma, beta, running_mean, running_var), each (Cout,)
    """
    J = adjs.shape[1]
    Cin, Cout = W.shape[1], W.shape[2]
    gamma, beta, mean, var = bn

    # forward() symmetrization: (A.T + A) / 2
    A = 0.5 * (jnp.swapaxes(adjs, 1, 2) + adjs)                    # (3, J, J)
    eye = jnp.eye(J, dtype=A.dtype)
    diag = jnp.sum(A * eye, axis=2)                                # (3, J)
    A_off = A * (1.0 - eye)                                        # zeroed diagonal

    # Lamda mixing: out = L1*WHA1 + (1-L1)*L2*WHA2 + (1-L1)*(1-L2)*L3*WHA3
    L1, L2, L3 = lamdas[0], lamdas[1], lamdas[2]
    mix = jnp.stack([L1, (1.0 - L1) * L2, (1.0 - L1) * (1.0 - L2) * L3])  # (3, J, Cout)

    # Diagonal (h0) contribution collapses over k: D[i,c] = sum_k mix_k[i,c] * diag_k[i]
    D = jnp.einsum('kic,ki->ic', mix, diag)                        # (J, Cout)

    # Bop[j,f,i,c] such that out[b,i,c] = sum_{j,f} x[b,j,f] * Bop[j,f,i,c]
    Bop = (jnp.einsum('ij,ic,fc->jfic', eye, D, W[0])              # diag term  (uses h0)
           + jnp.einsum('kij,kic,fc->jfic', A_off, mix, W[1]))     # off-diag   (uses h1)
    Bflat = Bop.reshape(J * Cin, J * Cout)

    # bias + eval-mode BatchNorm folded into per-channel scale/shift, tiled over J
    scale_c = gamma * jax.lax.rsqrt(var + BN_EPS)                  # (Cout,)
    shift_c = beta + (bias - mean) * scale_c                       # (Cout,)
    scale = jnp.tile(scale_c, J).reshape(1, J * Cout)
    shift = jnp.tile(shift_c, J).reshape(1, J * Cout)
    return Bflat, scale, shift


def graph_conv_forward(x, W, adjs, lamdas, bias, bn, *, block_b=512, use_bf16=False):
    """x: (B, J, Cin) float32 -> (B, J, Cout) float32."""
    B, J, Cin = x.shape
    Cout = W.shape[2]

    Bflat, scale, shift = fold_params(W, adjs, lamdas, bias, bn)

    # Lane-dense layout: flatten joints*features onto the lane axis.
    x2 = x.reshape(B, J * Cin)

    # Batch tiling: biggest tile <= block_b that respects the sublane constraint.
    min_sub = 16 if use_bf16 else 8
    tb = min(_round_up(block_b, min_sub), _round_up(B, min_sub))
    Bp = _round_up(B, tb)
    if Bp != B:
        x2 = jnp.pad(x2, ((0, Bp - B), (0, 0)))

    if use_bf16:
        # bf16 MXU path (v6e / v7x): f32 accumulation, BN/bias math stays f32.
        x2 = x2.astype(jnp.bfloat16)
        Bflat = Bflat.astype(jnp.bfloat16)

    grid = (Bp // tb,)
    out = pl.pallas_call(
        _graphconv_kernel,
        out_shape=jax.ShapeDtypeStruct((Bp, J * Cout), jnp.float32),
        grid_spec=pltpu.PrefetchScalarGridSpec(
            num_scalar_prefetch=0,
            grid=grid,
            in_specs=[
                pl.BlockSpec((tb, J * Cin), lambda b: (b, 0)),
                pl.BlockSpec((J * Cin, J * Cout), lambda b: (0, 0)),
                pl.BlockSpec((1, J * Cout), lambda b: (0, 0)),
                pl.BlockSpec((1, J * Cout), lambda b: (0, 0)),
            ],
            out_specs=pl.BlockSpec((tb, J * Cout), lambda b: (b, 0)),
        ),
        compiler_params=pltpu.CompilerParams(
            dimension_semantics=("parallel",)),
    )(x2, Bflat, scale, shift)

    return out[:B].reshape(B, J, Cout)


def make_params(key, J, Cin, Cout):
    ks = jax.random.split(key, 10)
    # W: xavier_uniform_ with gain=1.414 -> bound = gain * sqrt(6 / (Cin + Cout))
    bound = 1.414 * (6.0 / (Cin + Cout)) ** 0.5
    W = jax.random.uniform(ks[0], (2, Cin, Cout), jnp.float32, -bound, bound)
    # adjacency buffers + constant 1e-6 affinity modulation (added before symmetrization)
    adj = jax.random.uniform(ks[1], (J, J), jnp.float32)
    adj_ext1 = jax.random.uniform(ks[2], (J, J), jnp.float32)
    adj_ext2 = jax.random.uniform(ks[3], (J, J), jnp.float32)
    adjs = jnp.stack([adj, adj_ext1, adj_ext2]) + 1e-6
    # Lamda1..3: module initializes to ones; random values here so the correctness
    # check actually exercises the multi-hop mixing (ones zero the (1-L) branches).
    lamdas = jax.random.uniform(ks[4], (3, J, Cout), jnp.float32, 0.25, 0.75)
    # bias ~ U(-1/sqrt(Cout), 1/sqrt(Cout))
    stdv = 1.0 / (Cout ** 0.5)
    bias = jax.random.uniform(ks[5], (Cout,), jnp.float32, -stdv, stdv)
    # BatchNorm1d (eval mode): non-trivial running stats so the BN fold is exercised
    gamma = jax.random.uniform(ks[6], (Cout,), jnp.float32, 0.5, 1.5)
    beta = 0.1 * jax.random.normal(ks[7], (Cout,), jnp.float32)
    mean = 0.1 * jax.random.normal(ks[8], (Cout,), jnp.float32)
    var = jax.random.uniform(ks[9], (Cout,), jnp.float32, 0.5, 1.5)
    return W, adjs, lamdas, bias, (gamma, beta, mean, var)


def reference(x, W, adjs, lamdas, bias, bn):
    """Pure-JAX transcription of the original torch forward (eval-mode BN)."""
    J = x.shape[1]
    A = 0.5 * (jnp.swapaxes(adjs, 1, 2) + adjs)
    h0 = jnp.einsum('bjc,cd->bjd', x, W[0])
    h1 = jnp.einsum('bjc,cd->bjd', x, W[1])
    E = jnp.eye(J, dtype=x.dtype)

    def wha(a):
        return (jnp.einsum('ij,bjd->bid', a * E, h0)
                + jnp.einsum('ij,bjd->bid', a * (1.0 - E), h1))

    w1, w2, w3 = wha(A[0]), wha(A[1]), wha(A[2])
    L1, L2, L3 = lamdas[0], lamdas[1], lamdas[2]
    out = L1 * w1 + (1.0 - L1) * (L2 * w2) + (1.0 - L1) * ((1.0 - L2) * (L3 * w3))
    out = out + bias
    gamma, beta, mean, var = bn
    out = (out - mean) * (gamma * jax.lax.rsqrt(var + BN_EPS)) + beta
    return jnp.maximum(out, 0.0)


if __name__ == "__main__":
    B, J, Cin, Cout = 32, 16, 32, 32
    key = jax.random.PRNGKey(0)
    kx, kp = jax.random.split(key)
    x = jax.random.normal(kx, (B, J, Cin), jnp.float32)
    W, adjs, lamdas, bias, bn = make_params(kp, J, Cin, Cout)

    ref = reference(x, W, adjs, lamdas, bias, bn)

    # f32 path, batch tile of 8 -> 4 parallel grid steps
    out = graph_conv_forward(x, W, adjs, lamdas, bias, bn, block_b=8)
    out = jax.block_until_ready(out)
    assert out.shape == (B, J, Cout)
    assert jnp.allclose(out, ref, rtol=1e-4, atol=1e-4), "f32 mismatch vs JAX reference"

    # bf16 MXU path (v6e / v7x feedback), batch tile of 16 -> 2 parallel grid steps
    out_bf16 = graph_conv_forward(x, W, adjs, lamdas, bias, bn, block_b=16, use_bf16=True)
    out_bf16 = jax.block_until_ready(out_bf16)
    assert jnp.allclose(out_bf16, ref, rtol=5e-2, atol=5e-2), "bf16 mismatch vs JAX reference"

    print("KERNEL_OK")
</pallas_src>

<mosaic_0001>
module attributes {stable_mosaic.version = 11 : i64} {
  func.func @_graphconv_kernel(%arg0: i32, %arg1: memref<8x512xf32, #tpu.memory_space<vmem>>, %arg2: memref<512x512xf32, #tpu.memory_space<vmem>>, %arg3: memref<1x512xf32, #tpu.memory_space<vmem>>, %arg4: memref<1x512xf32, #tpu.memory_space<vmem>>, %arg5: memref<8x512xf32, #tpu.memory_space<vmem>>) attributes {dimension_semantics = [#tpu.dimension_semantics<parallel>], iteration_bounds = array<i64: 4>, scalar_prefetch = 0 : i64, scratch_operands = 0 : i64, tpu.core_type = #tpu.core_type<tc>, window_params = [{transform_indices = @transform_0, window_bounds = array<i64: 8, 512>}, {pipeline_mode = #tpu.pipeline_mode<synchronous>, transform_indices = @transform_1, window_bounds = array<i64: 512, 512>}, {pipeline_mode = #tpu.pipeline_mode<synchronous>, transform_indices = @transform_2, window_bounds = array<i64: 1, 512>}, {pipeline_mode = #tpu.pipeline_mode<synchronous>, transform_indices = @transform_3, window_bounds = array<i64: 1, 512>}, {transform_indices = @transform_4, window_bounds = array<i64: 8, 512>}]} {
    %c0 = arith.constant 0 : index
    %c0_0 = arith.constant 0 : index
    %0 = vector.load %arg1[%c0, %c0_0] : memref<8x512xf32, #tpu.memory_space<vmem>>, vector<8x512xf32>
    %c0_1 = arith.constant 0 : index
    %c0_2 = arith.constant 0 : index
    %1 = vector.load %arg2[%c0_1, %c0_2] : memref<512x512xf32, #tpu.memory_space<vmem>>, vector<512x512xf32>
    %cst = arith.constant dense<0.000000e+00> : vector<8x512xf32>
    %2 = tpu.matmul %0, %1, %cst {dimension_numbers = #tpu.dot_dimension_numbers<[1], [0], [0], [1], [0, 0, 1, 1], [], []>} : vector<8x512xf32>, vector<512x512xf32>, vector<8x512xf32> -> vector<8x512xf32>
    %c0_3 = arith.constant 0 : index
    %c0_4 = arith.constant 0 : index
    %3 = vector.load %arg3[%c0_3, %c0_4] : memref<1x512xf32, #tpu.memory_space<vmem>>, vector<1x512xf32>
    %4 = vector.broadcast %3 : vector<1x512xf32> to vector<8x512xf32>
    %5 = arith.mulf %2, %4 : vector<8x512xf32>
    %c0_5 = arith.constant 0 : index
    %c0_6 = arith.constant 0 : index
    %6 = vector.load %arg4[%c0_5, %c0_6] : memref<1x512xf32, #tpu.memory_space<vmem>>, vector<1x512xf32>
    %7 = vector.broadcast %6 : vector<1x512xf32> to vector<8x512xf32>
    %8 = arith.addf %5, %7 : vector<8x512xf32>
    %cst_7 = arith.constant 0.000000e+00 : f32
    %9 = vector.broadcast %cst_7 : f32 to vector<8x512xf32>
    %10 = arith.maximumf %8, %9 : vector<8x512xf32>
    %c0_8 = arith.constant 0 : index
    %c0_9 = arith.constant 0 : index
    %11 = vector.load %arg5[%c0_8, %c0_9] : memref<8x512xf32, #tpu.memory_space<vmem>>, vector<8x512xf32>
    tpu.vector_store %arg5[%c0_8, %c0_9], %10 {strides = array<i32>} : memref<8x512xf32, #tpu.memory_space<vmem>>, vector<8x512xf32>,
    return
  }
  func.func @transform_0(%arg0: i32) -> (i32, i32) {
    %c0_i32 = arith.constant 0 : i32
    %c0_i32_0 = arith.constant 0 : i32
    return %arg0, %c0_i32 : i32, i32
  }
  func.func @transform_1(%arg0: i32) -> (i32, i32) {
    %c0_i32 = arith.constant 0 : i32
    %c0_i32_0 = arith.constant 0 : i32
    %c0_i32_1 = arith.constant 0 : i32
    return %c0_i32, %c0_i32_0 : i32, i32
  }
  func.func @transform_2(%arg0: i32) -> (i32, i32) {
    %c0_i32 = arith.constant 0 : i32
    %c0_i32_0 = arith.constant 0 : i32
    %c0_i32_1 = arith.constant 0 : i32
    return %c0_i32, %c0_i32_0 : i32, i32
  }
  func.func @transform_3(%arg0: i32) -> (i32, i32) {
    %c0_i32 = arith.constant 0 : i32
    %c0_i32_0 = arith.constant 0 : i32
    %c0_i32_1 = arith.constant 0 : i32
    return %c0_i32, %c0_i32_0 : i32, i32
  }
  func.func @transform_4(%arg0: i32) -> (i32, i32) {
    %c0_i32 = arith.constant 0 : i32
    %c0_i32_0 = arith.constant 0 : i32
    return %arg0, %c0_i32 : i32, i32
  }
}

</mosaic_0001>

<bundles_post_ra>
// kernel: tpu_custom_call.1
= control target key start
LH: loop header
LB: loop body
LE: loop exit
PB: predicated region body
PF: predicated region fallthrough
CT: control target
= control target key end

     0   :  { %9 = vsyncpa [#allocation3], 0  ;;  %s1516_s0 = inlined_call_operand.hbm [shape: f32[32,512], index: 0, kind: input, shape index: {}]   ;;  %s1517_s1 = inlined_call_operand.hbm [shape: f32[512,512], index: 1, kind: input, shape index: {}]   ;;  %s1518_s2 = inlined_call_operand.hbm [shape: f32[1,512], index: 2, kind: input, shape index: {}]   ;;  %s1519_s3 = inlined_call_operand.hbm [shape: f32[1,512], index: 3, kind: input, shape index: {}]   ;;  %s1520_s4 = inlined_call_operand.hbm [shape: f32[32,512], index: 4, kind: output, shape index: {}]  }
   0x1   :  { %11 = vsyncpa [#allocation3 + $0x1], 0 }
   0x2   :  { %12 = vsyncpa [#allocation6], 0 }
   0x3   :  { %13 = vsyncpa [#allocation9], 0 }
   0x4   :  { %14 = vsyncpa [#allocation4], 0 }
   0x5   :  { %16 = vsyncpa [#allocation4 + $0x1], 0  ;;  %s1321_s15 = smov 0   ;;  %s1323_s16 = smov 0  }
   0x6   :  { %s1325_s17 = smov 0   ;;  %s1327_s18 = smov 0  }
   0x7 LB: > { %s153_s21 = sshll.u32 %s1517_s1, 4  ;;  %s1345_s22 = sadd.s32 4294967295, %s1289_s18   ;;  %s1289_s18 = sphi %s1327_s18, %s1530_s18   ;;  %s1285_s17 = sphi %s1325_s17, %s1529_s17   ;;  %s1281_s16 = sphi %s1323_s16, %s1528_s16   ;;  %s1277_s15 = sphi %s1321_s15, %s1527_s15   ;;  %s154_s21 = int_to_ptr.hbm [resolvable:$true] %s153_s21 }
   0x8   : > { %p995_p0 = scmp.ge.s32.totalorder %s1289_s18, 1  ;;  %p43_p1 = scmp.eq.s32.totalorder %s1345_s22, 0 }
   0x9   : > { %p142_p2 = scmp.lt.s32.totalorder %s1289_s18, 5  ;;  %s1291_s24 = smov [#allocation5]  }
   0xa   : > { %s155_s25 = sshll.u32 %s1291_s24, 4  ;;  %s168_s28 = sshll.u32 %s1518_s2, 4  ;;  %s156_s25 = int_to_ptr.vmem [resolvable:$true] %s155_s25  ;;  %s169_s28 = int_to_ptr.hbm [resolvable:$true] %s168_s28 }
   0xb   : > { %p1350_p3 = pnand %p995_p0, %p142_p2  ;;  %s180_s6 = sshll.u32 %s1519_s3, 4  ;;  %s181_s6 = int_to_ptr.hbm [resolvable:$true] %s180_s6 }
   0xc   : > { %s1292_s7 = smov [#allocation7]   ;;  %s1293_s9 = smov 512  }
   0xd   : > { %p1032_p4 = pneg %p1350_p3  ;;  %s170_s8 = sshll.u32 %s1292_s7, 4  ;;  %s171_s8 = int_to_ptr.vmem [resolvable:$true] %s170_s8 }
   0xe   : > { %s1294_s10 = smov 32   ;;  %s1295_s11 = smov [#allocation8]  }
   0xf   : > { %p1361_p5 = pnand %p1032_p4, %p43_p1  ;;  %s182_s12 = sshll.u32 %s1295_s11, 4  ;;  %s183_s12 = int_to_ptr.vmem [resolvable:$true] %s182_s12 }
  0x10   : > { %s994_s13 = sadd.s32 4294967294, %s1289_s18   ;;  %s1376_s14 = sadd.s32 1, %s1289_s18  }
  0x11   : > { %1035 = dma.hbm_to_vmem [thread:$0]  (!%p1361_p5), %s154_s21, 32768, %s156_s25, [#allocation6], %s1293_s9, %s1293_s9, %s1294_s10  }
  0x12   : > { %1038 = dma.hbm_to_vmem [thread:$0]  (!%p1361_p5), %s169_s28, 64, %s171_s8, [#allocation6]  }
  0x13   : > { %1041 = dma.hbm_to_vmem [thread:$0]  (!%p1361_p5), %s181_s6, 64, %s183_s12, [#allocation9]  }
  0x14   : > { %s29_s19 = sadd.s32 1, %s1285_s17  ;;  %s26_s20 = ssub.s32 %s1289_s18, %s1376_s14 }
  0x15   : > { %p36_p6 = scmp.ne.s32.totalorder %s1285_s17, %s1281_s16  ;;  %p27_p7 = scmp.eq.s32.totalorder %s26_s20, 0 }
  0x16   : > { %p37_p8 = scmp.eq.s32.totalorder %s1289_s18, 0  ;;  %p42_p9 = scmp.ne.s32.totalorder %s1281_s16, %s1277_s15 }
  0x17   : > { %p129_p10 = scmp.eq.s32.totalorder %s1345_s22, 3  ;;  %p135_p13 = scmp.eq.s32.totalorder %s994_s13, 3 }
  0x18   : > { %s1388_s21 = scalar_select %p27_p7, %s1285_s17, %s29_s19  }
  0x19   : > { %p1392_p11 = por %p43_p1, %p42_p9  ;;  %p1396_p12 = por %p129_p10, %p36_p6 }
  0x1a   : > { %p38_p0 = por %p37_p8, %p36_p6  ;;  %s193_s26 = sand.u32 1, %s1285_s17  }
  0x1b   : > { %p1401_p2 = por %p135_p13, %p42_p9  ;;  %p1053_p4 = scmp.lt.s32.totalorder %s1289_s18, 4 }
  0x1c   : > { %s1000_s28 = sshll.u32 %s193_s26, 5  ;;  %s1014_s29 = sshll.u32 %s1289_s18, 5 }
  0x1d   : > { %s202_s6 = scalar_lea.hbm %s1516_s0, %s1014_s29  ;;  %s197_s8 = scalar_lea.vmem [#allocation2], %s1000_s28 }
  0x1e   : > { %s204_s7 = sshll.u32 %s202_s6, 4  ;;  %s206_s9 = sshll.u32 %s197_s8, 4  ;;  %s205_s7 = int_to_ptr.hbm [resolvable:$true] %s204_s7  ;;  %s207_s9 = int_to_ptr.vmem [resolvable:$true] %s206_s9 }
  0x1f   : > { %p1410_p5 = pnand %p1053_p4, %p38_p0  ;;  %s194_s11 = scalar_lea.sflag [#allocation3], %s193_s26 }
  0x20   : > { %s1185_s12 = sshra.s32 %s205_s7, 4  ;;  %s1192_s28 = scalar_lea.hbm %s1516_s0, 128  ;;  %s1186_s12 = int_to_ptr.hbm [resolvable:$true] %s1185_s12 }
  0x21   : > { %s1187_s13 = scalar_lea.hbm %s1186_s12, 32  ;;  %p1189_p7 = pneg %p1410_p5 }
  0x22   : > { %p1188_p6 = scmp.ne.s32.totalorder %s1186_s12, %s1187_s13  ;;  %p1193_p10 = scmp.lt.s32.totalorder %s1186_s12, %s1516_s0 }
  0x23   : > { %p1194_p13 = scmp.lt.s32.totalorder %s1192_s28, %s1187_s13 }
  0x24   : > { %p1190_p8 = pnand %p1189_p7, %p1188_p6 }
  0x25   : > { %p1195_p0 = por %p1194_p13, %p1193_p10 }
  0x26   : > { %p1191_p9 = pneg %p1190_p8 }
  0x28   : > { %p1196_p4 = pnand %p1195_p0, %p1191_p9 }
  0x2a   : > { %1199 = shalt.err (!%p1196_p4)
}
  0x2b   : > { %1045 = dma.hbm_to_vmem [thread:$0]  (!%p1410_p5), %s205_s7, 512, %s207_s9, %s194_s11  }
  0x2c   : > { %215 = sbr.rel (%p1350_p3) target bundleno = 362 (0x16a), region = 36  ;;  %s1427_s26 = sand.u32 (!%p1350_p3), 1, %s1281_s16  }
  0x2d   : > { %s1004_s5 = sshll.u32 (!%p1350_p3), %s1427_s26, 5  ;;  %s218_s6 = scalar_lea.sflag (!%p1350_p3), [#allocation3], %s1427_s26 }
  0x2e   : > { %s1433_s8 = scalar_lea.vmem (!%p1350_p3), [#allocation2], %s1004_s5 }
  0x31   : > { %1260 = dma.done.wait (%p1392_p11), %s218_s6, 512  }
  0x32   : > { %1262 = vsyncadd (%p1392_p11), %s218_s6, 4294966784 }
  0x33   : > { %1264 = dma.done.wait (%p43_p1), [#allocation6], 32832  }
  0x34   : > { %1266 = vsyncadd (%p43_p1), [#allocation6], 4294934464 }
  0x35   : > { %1268 = dma.done.wait (%p43_p1), [#allocation9], 64  }
  0x36   : > { %1270 = vsyncadd (%p43_p1), [#allocation9], 4294967232  ;;  %v454_v0 = vld [vmem:[#allocation5 + $0x5e0] sm:$0xff]  ;;  %v455_v62 = vld [vmem:[#allocation5 + $0x5e8] sm:$0xff]  ;;  %s1477_s23 = scalar_lea.vmem [#allocation10], %s1004_s5  ;;  %s1015_s24 = sshll.u32 %s1345_s22, 5 }
  0x37   : > { %v450_v1 = vld [vmem:[#allocation5 + $0x5c0] sm:$0xff]  ;;  %562 = vmatpush.msra.mxu2 %v454_v0  ;;  %v519_v63 = vld [vmem:[#allocation5 + $0x7e8] sm:$0xff]  ;;  %s890_s10 = scalar_lea.hbm %s1520_s4, %s1015_s24  ;;  %s892_s11 = sshll.u32 %s1477_s23, 4  ;;  %s893_s11 = int_to_ptr.vmem [resolvable:$true] %s892_s11 }
  0x38   : > { %v518_v2 = vld [vmem:[#allocation5 + $0x7e0] sm:$0xff]  ;;  %s894_s12 = sshll.u32 %s890_s10, 4  ;;  %s879_s22 = scalar_lea.sflag [#allocation4], %s1427_s26  ;;  %s895_s12 = int_to_ptr.hbm [resolvable:$true] %s894_s12 }
  0x39   : > { %582 = vmatpush.msra.mxu3 %v518_v2  ;;  %v326_v3 = vld [vmem:[#allocation5 + $0x1e0] sm:$0xff]  ;;  %563 = vmatpush.msra.mxu2 %v450_v1  ;;  %v451_v2 = vld [vmem:[#allocation5 + $0x5c8] sm:$0xff]  ;;  %s1229_s13 = sshra.s32 %s895_s12, 4  ;;  %s1235_s29 = scalar_lea.hbm %s1520_s4, 128  ;;  %s1230_s13 = int_to_ptr.hbm [resolvable:$true] %s1229_s13 }
  0x3a   : > { %v390_v4 = vld [vmem:[#allocation5 + $0x3e0] sm:$0xff]  ;;  %522 = vmatpush.msra.mxu0 %v326_v3  ;;  %v327_v3 = vld [vmem:[#allocation5 + $0x1e8] sm:$0xff]  ;;  %s1231_s19 = scalar_lea.hbm %s1230_s13, 32  ;;  %p1236_p5 = scmp.lt.s32.totalorder %s1230_s13, %s1520_s4 }
  0x3b   : > { %v446_v5 = vld [vmem:[#allocation5 + $0x5a0] sm:$0xff]  ;;  %542 = vmatpush.msra.mxu1 %v390_v4  ;;  %v391_v4 = vld [vmem:[#allocation5 + $0x3e8] sm:$0xff]  ;;  %p1232_p1 = scmp.ne.s32.totalorder %s1230_s13, %s1231_s19  ;;  %p1237_p6 = scmp.lt.s32.totalorder %s1235_s29, %s1231_s19 }
  0x3c   : > { %v514_v6 = vld [vmem:[#allocation5 + $0x7c0] sm:$0xff]  ;;  %564 = vmatpush.msra.mxu2 %v446_v5  ;;  %v515_v5 = vld [vmem:[#allocation5 + $0x7c8] sm:$0xff] }
  0x3d   : > { %v322_v7 = vld [vmem:[#allocation5 + $0x1c0] sm:$0xff]  ;;  %583 = vmatpush.msra.mxu3 %v514_v6  ;;  %v447_v6 = vld [vmem:[#allocation5 + $0x5a8] sm:$0xff]  ;;  %p1233_p3 = pnand %p1232_p1, %p1396_p12  ;;  %p1238_p7 = por %p1237_p6, %p1236_p5 }
  0x3e   : > { %v386_v8 = vld [vmem:[#allocation5 + $0x3c0] sm:$0xff]  ;;  %523 = vmatpush.msra.mxu0 %v322_v7  ;;  %v323_v7 = vld [vmem:[#allocation5 + $0x1c8] sm:$0xff] }
  0x3f   : > { %v510_v9 = vld [vmem:[#allocation5 + $0x7a0] sm:$0xff]  ;;  %543 = vmatpush.msra.mxu1 %v386_v8  ;;  %v387_v8 = vld [vmem:[#allocation5 + $0x3c8] sm:$0xff]  ;;  %p1234_p11 = pneg %p1233_p3 }
  0x40   : > { %v318_v10 = vld [vmem:[#allocation5 + $0x1a0] sm:$0xff]  ;;  %584 = vmatpush.msra.mxu3 %v510_v9  ;;  %v511_v9 = vld [vmem:[#allocation5 + $0x7a8] sm:$0xff] }
  0x41   : > { %v442_v11 = vld [vmem:[#allocation5 + $0x580] sm:$0xff]  ;;  %524 = vmatpush.msra.mxu0 %v318_v10  ;;  %v443_v10 = vld [vmem:[#allocation5 + $0x588] sm:$0xff]  ;;  %p1239_p8 = pnand %p1238_p7, %p1234_p11 }
  0x42   : > { %v382_v12 = vld [vmem:[#allocation5 + $0x3a0] sm:$0xff]  ;;  %565 = vmatpush.msra.mxu2 %v442_v11  ;;  %v319_v11 = vld [vmem:[#allocation5 + $0x1a8] sm:$0xff] }
  0x43   : > { %v506_v13 = vld [vmem:[#allocation5 + $0x780] sm:$0xff]  ;;  %544 = vmatpush.msra.mxu1 %v382_v12  ;;  %v383_v12 = vld [vmem:[#allocation5 + $0x3a8] sm:$0xff] }
  0x44   : > { %v314_v14 = vld [vmem:[#allocation5 + $0x180] sm:$0xff]  ;;  %585 = vmatpush.msra.mxu3 %v506_v13  ;;  %v507_v13 = vld [vmem:[#allocation5 + $0x788] sm:$0xff] }
  0x45   : > { %v378_v15 = vld [vmem:[#allocation5 + $0x380] sm:$0xff]  ;;  %525 = vmatpush.msra.mxu0 %v314_v14  ;;  %v439_v14 = vld [vmem:[#allocation5 + $0x568] sm:$0xff] }
  0x46   : > { %v438_v16 = vld [vmem:[#allocation5 + $0x560] sm:$0xff]  ;;  %545 = vmatpush.msra.mxu1 %v378_v15  ;;  %v315_v15 = vld [vmem:[#allocation5 + $0x188] sm:$0xff] }
  0x47   : > { %v502_v17 = vld [vmem:[#allocation5 + $0x760] sm:$0xff]  ;;  %566 = vmatpush.msra.mxu2 %v438_v16  ;;  %v379_v16 = vld [vmem:[#allocation5 + $0x388] sm:$0xff] }
  0x48   : > { %v310_v18 = vld [vmem:[#allocation5 + $0x160] sm:$0xff]  ;;  %586 = vmatpush.msra.mxu3 %v502_v17  ;;  %v503_v17 = vld [vmem:[#allocation5 + $0x768] sm:$0xff] }
  0x49   : > { %v374_v19 = vld [vmem:[#allocation5 + $0x360] sm:$0xff]  ;;  %526 = vmatpush.msra.mxu0 %v310_v18  ;;  %v435_v18 = vld [vmem:[#allocation5 + $0x548] sm:$0xff] }
  0x4a   : > { %v434_v20 = vld [vmem:[#allocation5 + $0x540] sm:$0xff]  ;;  %546 = vmatpush.msra.mxu1 %v374_v19  ;;  %v311_v19 = vld [vmem:[#allocation5 + $0x168] sm:$0xff] }
  0x4b   : > { %v498_v21 = vld [vmem:[#allocation5 + $0x740] sm:$0xff]  ;;  %567 = vmatpush.msra.mxu2 %v434_v20  ;;  %v375_v20 = vld [vmem:[#allocation5 + $0x368] sm:$0xff] }
  0x4c   : > { %v306_v22 = vld [vmem:[#allocation5 + $0x140] sm:$0xff]  ;;  %587 = vmatpush.msra.mxu3 %v498_v21  ;;  %v499_v21 = vld [vmem:[#allocation5 + $0x748] sm:$0xff] }
  0x4d   : > { %v370_v23 = vld [vmem:[#allocation5 + $0x340] sm:$0xff]  ;;  %527 = vmatpush.msra.mxu0 %v306_v22  ;;  %v431_v22 = vld [vmem:[#allocation5 + $0x528] sm:$0xff] }
  0x4e   : > { %v430_v24 = vld [vmem:[#allocation5 + $0x520] sm:$0xff]  ;;  %547 = vmatpush.msra.mxu1 %v370_v23  ;;  %v307_v23 = vld [vmem:[#allocation5 + $0x148] sm:$0xff] }
  0x4f   : > { %v494_v25 = vld [vmem:[#allocation5 + $0x720] sm:$0xff]  ;;  %568 = vmatpush.msra.mxu2 %v430_v24  ;;  %v371_v24 = vld [vmem:[#allocation5 + $0x348] sm:$0xff] }
  0x50   : > { %v302_v26 = vld [vmem:[#allocation5 + $0x120] sm:$0xff]  ;;  %588 = vmatpush.msra.mxu3 %v494_v25  ;;  %v495_v25 = vld [vmem:[#allocation5 + $0x728] sm:$0xff] }
  0x51   : > { %v366_v27 = vld [vmem:[#allocation5 + $0x320] sm:$0xff]  ;;  %528 = vmatpush.msra.mxu0 %v302_v26  ;;  %v427_v26 = vld [vmem:[#allocation5 + $0x508] sm:$0xff] }
  0x52   : > { %v426_v28 = vld [vmem:[#allocation5 + $0x500] sm:$0xff]  ;;  %548 = vmatpush.msra.mxu1 %v366_v27  ;;  %v303_v27 = vld [vmem:[#allocation5 + $0x128] sm:$0xff] }
  0x53   : > { %v490_v29 = vld [vmem:[#allocation5 + $0x700] sm:$0xff]  ;;  %569 = vmatpush.msra.mxu2 %v426_v28  ;;  %v367_v28 = vld [vmem:[#allocation5 + $0x328] sm:$0xff] }
  0x54   : > { %v298_v30 = vld [vmem:[#allocation5 + $0x100] sm:$0xff]  ;;  %589 = vmatpush.msra.mxu3 %v490_v29  ;;  %v491_v29 = vld [vmem:[#allocation5 + $0x708] sm:$0xff] }
  0x55   : > { %v362_v31 = vld [vmem:[#allocation5 + $0x300] sm:$0xff]  ;;  %529 = vmatpush.msra.mxu0 %v298_v30  ;;  %v423_v30 = vld [vmem:[#allocation5 + $0x4e8] sm:$0xff] }
  0x56   : > { %v422_v32 = vld [vmem:[#allocation5 + $0x4e0] sm:$0xff]  ;;  %549 = vmatpush.msra.mxu1 %v362_v31  ;;  %v299_v31 = vld [vmem:[#allocation5 + $0x108] sm:$0xff] }
  0x57   : > { %v486_v33 = vld [vmem:[#allocation5 + $0x6e0] sm:$0xff]  ;;  %570 = vmatpush.msra.mxu2 %v422_v32  ;;  %v363_v32 = vld [vmem:[#allocation5 + $0x308] sm:$0xff] }
  0x58   : > { %v294_v34 = vld [vmem:[#allocation5 + $0xe0] sm:$0xff]  ;;  %590 = vmatpush.msra.mxu3 %v486_v33  ;;  %v487_v33 = vld [vmem:[#allocation5 + $0x6e8] sm:$0xff] }
  0x59   : > { %v358_v35 = vld [vmem:[#allocation5 + $0x2e0] sm:$0xff]  ;;  %530 = vmatpush.msra.mxu0 %v294_v34  ;;  %v419_v34 = vld [vmem:[#allocation5 + $0x4c8] sm:$0xff] }
  0x5a   : > { %v418_v36 = vld [vmem:[#allocation5 + $0x4c0] sm:$0xff]  ;;  %550 = vmatpush.msra.mxu1 %v358_v35  ;;  %v295_v35 = vld [vmem:[#allocation5 + $0xe8] sm:$0xff] }
  0x5b   : > { %v482_v37 = vld [vmem:[#allocation5 + $0x6c0] sm:$0xff]  ;;  %571 = vmatpush.msra.mxu2 %v418_v36  ;;  %v359_v36 = vld [vmem:[#allocation5 + $0x2e8] sm:$0xff] }
  0x5c   : > { %v290_v38 = vld [vmem:[#allocation5 + $0xc0] sm:$0xff]  ;;  %591 = vmatpush.msra.mxu3 %v482_v37  ;;  %v483_v37 = vld [vmem:[#allocation5 + $0x6c8] sm:$0xff] }
  0x5d   : > { %v354_v39 = vld [vmem:[#allocation5 + $0x2c0] sm:$0xff]  ;;  %531 = vmatpush.msra.mxu0 %v290_v38  ;;  %v415_v38 = vld [vmem:[#allocation5 + $0x4a8] sm:$0xff] }
  0x5e   : > { %v414_v40 = vld [vmem:[#allocation5 + $0x4a0] sm:$0xff]  ;;  %551 = vmatpush.msra.mxu1 %v354_v39  ;;  %v291_v39 = vld [vmem:[#allocation5 + $0xc8] sm:$0xff] }
  0x5f   : > { %v478_v41 = vld [vmem:[#allocation5 + $0x6a0] sm:$0xff]  ;;  %572 = vmatpush.msra.mxu2 %v414_v40  ;;  %v355_v40 = vld [vmem:[#allocation5 + $0x2c8] sm:$0xff] }
  0x60   : > { %v286_v42 = vld [vmem:[#allocation5 + $0xa0] sm:$0xff]  ;;  %592 = vmatpush.msra.mxu3 %v478_v41  ;;  %v479_v41 = vld [vmem:[#allocation5 + $0x6a8] sm:$0xff] }
  0x61   : > { %v350_v43 = vld [vmem:[#allocation5 + $0x2a0] sm:$0xff]  ;;  %532 = vmatpush.msra.mxu0 %v286_v42  ;;  %v411_v42 = vld [vmem:[#allocation5 + $0x488] sm:$0xff] }
  0x62   : > { %v410_v44 = vld [vmem:[#allocation5 + $0x480] sm:$0xff]  ;;  %552 = vmatpush.msra.mxu1 %v350_v43  ;;  %v287_v43 = vld [vmem:[#allocation5 + $0xa8] sm:$0xff] }
  0x63   : > { %v474_v45 = vld [vmem:[#allocation5 + $0x680] sm:$0xff]  ;;  %573 = vmatpush.msra.mxu2 %v410_v44  ;;  %v351_v44 = vld [vmem:[#allocation5 + $0x2a8] sm:$0xff] }
  0x64   : > { %v282_v46 = vld [vmem:[#allocation5 + $0x80] sm:$0xff]  ;;  %593 = vmatpush.msra.mxu3 %v474_v45  ;;  %v475_v45 = vld [vmem:[#allocation5 + $0x688] sm:$0xff] }
  0x65   : > { %v346_v47 = vld [vmem:[#allocation5 + $0x280] sm:$0xff]  ;;  %533 = vmatpush.msra.mxu0 %v282_v46  ;;  %v407_v46 = vld [vmem:[#allocation5 + $0x468] sm:$0xff] }
  0x66   : > { %v406_v48 = vld [vmem:[#allocation5 + $0x460] sm:$0xff]  ;;  %553 = vmatpush.msra.mxu1 %v346_v47  ;;  %v283_v47 = vld [vmem:[#allocation5 + $0x88] sm:$0xff] }
  0x67   : > { %v470_v49 = vld [vmem:[#allocation5 + $0x660] sm:$0xff]  ;;  %574 = vmatpush.msra.mxu2 %v406_v48  ;;  %v347_v48 = vld [vmem:[#allocation5 + $0x288] sm:$0xff] }
  0x68   : > { %v278_v50 = vld [vmem:[#allocation5 + $0x60] sm:$0xff]  ;;  %594 = vmatpush.msra.mxu3 %v470_v49  ;;  %v471_v49 = vld [vmem:[#allocation5 + $0x668] sm:$0xff] }
  0x69   : > { %v342_v51 = vld [vmem:[#allocation5 + $0x260] sm:$0xff]  ;;  %534 = vmatpush.msra.mxu0 %v278_v50  ;;  %v403_v50 = vld [vmem:[#allocation5 + $0x448] sm:$0xff] }
  0x6a   : > { %v402_v52 = vld [vmem:[#allocation5 + $0x440] sm:$0xff]  ;;  %554 = vmatpush.msra.mxu1 %v342_v51  ;;  %v279_v51 = vld [vmem:[#allocation5 + $0x68] sm:$0xff] }
  0x6b   : > { %v466_v53 = vld [vmem:[#allocation5 + $0x640] sm:$0xff]  ;;  %575 = vmatpush.msra.mxu2 %v402_v52  ;;  %v343_v52 = vld [vmem:[#allocation5 + $0x268] sm:$0xff] }
  0x6c   : > { %v274_v54 = vld [vmem:[#allocation5 + $0x40] sm:$0xff]  ;;  %595 = vmatpush.msra.mxu3 %v466_v53  ;;  %v467_v53 = vld [vmem:[#allocation5 + $0x648] sm:$0xff] }
  0x6d   : > { %v338_v55 = vld [vmem:[#allocation5 + $0x240] sm:$0xff]  ;;  %535 = vmatpush.msra.mxu0 %v274_v54  ;;  %v399_v54 = vld [vmem:[#allocation5 + $0x428] sm:$0xff] }
  0x6e   : > { %v398_v56 = vld [vmem:[#allocation5 + $0x420] sm:$0xff]  ;;  %555 = vmatpush.msra.mxu1 %v338_v55  ;;  %v275_v55 = vld [vmem:[#allocation5 + $0x48] sm:$0xff] }
  0x6f   : > { %v462_v57 = vld [vmem:[#allocation5 + $0x620] sm:$0xff]  ;;  %576 = vmatpush.msra.mxu2 %v398_v56  ;;  %v339_v56 = vld [vmem:[#allocation5 + $0x248] sm:$0xff] }
  0x70   : > { %v270_v58 = vld [vmem:[#allocation5 + $0x20] sm:$0xff]  ;;  %596 = vmatpush.msra.mxu3 %v462_v57  ;;  %v463_v57 = vld [vmem:[#allocation5 + $0x628] sm:$0xff] }
  0x71   : > { %v334_v59 = vld [vmem:[#allocation5 + $0x220] sm:$0xff]  ;;  %536 = vmatpush.msra.mxu0 %v270_v58  ;;  %v395_v58 = vld [vmem:[#allocation5 + $0x408] sm:$0xff] }
  0x72   : > { %v394_v60 = vld [vmem:[#allocation5 + $0x400] sm:$0xff]  ;;  %556 = vmatpush.msra.mxu1 %v334_v59  ;;  %v271_v59 = vld [vmem:[#allocation5 + $0x28] sm:$0xff] }
  0x73   : > { %v458_v61 = vld [vmem:[#allocation5 + $0x600] sm:$0xff]  ;;  %577 = vmatpush.msra.mxu2 %v394_v60  ;;  %v1448_v60 = vld [vmem:[%s1433_s8 + $0x10] sm:$0xff] }
  0x74   : > { %v266_v0 = vld [vmem:[#allocation5] sm:$0xff]  ;;  %597 = vmatpush.msra.mxu3 %v458_v61  ;;  %v335_v61 = vld [vmem:[#allocation5 + $0x228] sm:$0xff]  ;;  %578 = vmatmul.f32.vlgmr.msra.gmra.mxu2 %v1448_v60 }
  0x75   : > { %v330_v1 = vld [vmem:[#allocation5 + $0x200] sm:$0xff]  ;;  %642 = vmatpush.msrb.mxu2 %v455_v62  ;;  %537 = vmatpush.msra.mxu0 %v266_v0  ;;  %v456_v62 = vld [vmem:[#allocation5 + $0x5f0] sm:$0xff]  ;;  %v1451_v0 = vld [vmem:[%s1433_s8 + $0x18] sm:$0xff] }
  0x76   : > { %662 = vmatpush.msrb.mxu3 %v519_v63  ;;  %557 = vmatpush.msra.mxu1 %v330_v1  ;;  %v459_v63 = vld [vmem:[#allocation5 + $0x608] sm:$0xff] }
  0x77   : > { %643 = vmatpush.msrb.mxu2 %v451_v2  ;;  %602 = vmatpush.msrb.mxu0 %v327_v3  ;;  %v267_v1 = vld [vmem:[#allocation5 + $0x8] sm:$0xff]  ;;  %v452_v2 = vld [vmem:[#allocation5 + $0x5d0] sm:$0xff] }
  0x78   : > { %622 = vmatpush.msrb.mxu1 %v391_v4  ;;  %663 = vmatpush.msrb.mxu3 %v515_v5  ;;  %v520_v3 = vld [vmem:[#allocation5 + $0x7f0] sm:$0xff]  ;;  %v331_v4 = vld [vmem:[#allocation5 + $0x208] sm:$0xff]  ;;  %v1455_v5 = vld [vmem:[%s1433_s8] sm:$0xff] }
  0x79   : > { %644 = vmatpush.msrb.mxu2 %v447_v6  ;;  %603 = vmatpush.msrb.mxu0 %v323_v7  ;;  %v1459_v6 = vld [vmem:[%s1433_s8 + $0x8] sm:$0xff]  ;;  %v328_v7 = vld [vmem:[#allocation5 + $0x1f0] sm:$0xff] }
  0x7a   : > { %623 = vmatpush.msrb.mxu1 %v387_v8  ;;  %664 = vmatpush.msrb.mxu3 %v511_v9  ;;  %v392_v8 = vld [vmem:[#allocation5 + $0x3f0] sm:$0xff] }
  0x7b   : > { %645 = vmatpush.msrb.mxu2 %v443_v10  ;;  %604 = vmatpush.msrb.mxu0 %v319_v11  ;;  %v448_v9 = vld [vmem:[#allocation5 + $0x5b0] sm:$0xff] }
  0x7c   : > { %624 = vmatpush.msrb.mxu1 %v383_v12  ;;  %665 = vmatpush.msrb.mxu3 %v507_v13  ;;  %v516_v10 = vld [vmem:[#allocation5 + $0x7d0] sm:$0xff] }
  0x7d   : > { %646 = vmatpush.msrb.mxu2 %v439_v14  ;;  %605 = vmatpush.msrb.mxu0 %v315_v15  ;;  %v324_v11 = vld [vmem:[#allocation5 + $0x1d0] sm:$0xff] }
  0x7e   : > { %625 = vmatpush.msrb.mxu1 %v379_v16  ;;  %666 = vmatpush.msrb.mxu3 %v503_v17  ;;  %v388_v12 = vld [vmem:[#allocation5 + $0x3d0] sm:$0xff] }
  0x7f   : > { %647 = vmatpush.msrb.mxu2 %v435_v18  ;;  %606 = vmatpush.msrb.mxu0 %v311_v19  ;;  %v444_v13 = vld [vmem:[#allocation5 + $0x590] sm:$0xff] }
  0x80   : > { %626 = vmatpush.msrb.mxu1 %v375_v20  ;;  %667 = vmatpush.msrb.mxu3 %v499_v21  ;;  %v512_v14 = vld [vmem:[#allocation5 + $0x7b0] sm:$0xff] }
  0x81   : > { %648 = vmatpush.msrb.mxu2 %v431_v22  ;;  %607 = vmatpush.msrb.mxu0 %v307_v23  ;;  %v320_v15 = vld [vmem:[#allocation5 + $0x1b0] sm:$0xff] }
  0x82   : > { %627 = vmatpush.msrb.mxu1 %v371_v24  ;;  %668 = vmatpush.msrb.mxu3 %v495_v25  ;;  %v384_v16 = vld [vmem:[#allocation5 + $0x3b0] sm:$0xff] }
  0x83   : > { %649 = vmatpush.msrb.mxu2 %v427_v26  ;;  %608 = vmatpush.msrb.mxu0 %v303_v27  ;;  %v440_v17 = vld [vmem:[#allocation5 + $0x570] sm:$0xff] }
  0x84   : > { %628 = vmatpush.msrb.mxu1 %v367_v28  ;;  %669 = vmatpush.msrb.mxu3 %v491_v29  ;;  %v508_v18 = vld [vmem:[#allocation5 + $0x790] sm:$0xff] }
  0x85   : > { %650 = vmatpush.msrb.mxu2 %v423_v30  ;;  %609 = vmatpush.msrb.mxu0 %v299_v31  ;;  %v316_v19 = vld [vmem:[#allocation5 + $0x190] sm:$0xff] }
  0x86   : > { %629 = vmatpush.msrb.mxu1 %v363_v32  ;;  %670 = vmatpush.msrb.mxu3 %v487_v33  ;;  %v380_v20 = vld [vmem:[#allocation5 + $0x390] sm:$0xff] }
  0x87   : > { %651 = vmatpush.msrb.mxu2 %v419_v34  ;;  %610 = vmatpush.msrb.mxu0 %v295_v35  ;;  %v436_v21 = vld [vmem:[#allocation5 + $0x550] sm:$0xff] }
  0x88   : > { %630 = vmatpush.msrb.mxu1 %v359_v36  ;;  %671 = vmatpush.msrb.mxu3 %v483_v37  ;;  %v504_v22 = vld [vmem:[#allocation5 + $0x770] sm:$0xff] }
  0x89   : > { %652 = vmatpush.msrb.mxu2 %v415_v38  ;;  %611 = vmatpush.msrb.mxu0 %v291_v39  ;;  %v312_v23 = vld [vmem:[#allocation5 + $0x170] sm:$0xff] }
  0x8a   : > { %631 = vmatpush.msrb.mxu1 %v355_v40  ;;  %672 = vmatpush.msrb.mxu3 %v479_v41  ;;  %v376_v24 = vld [vmem:[#allocation5 + $0x370] sm:$0xff] }
  0x8b   : > { %653 = vmatpush.msrb.mxu2 %v411_v42  ;;  %612 = vmatpush.msrb.mxu0 %v287_v43  ;;  %v432_v25 = vld [vmem:[#allocation5 + $0x530] sm:$0xff] }
  0x8c   : > { %632 = vmatpush.msrb.mxu1 %v351_v44  ;;  %673 = vmatpush.msrb.mxu3 %v475_v45  ;;  %v500_v26 = vld [vmem:[#allocation5 + $0x750] sm:$0xff] }
  0x8d   : > { %654 = vmatpush.msrb.mxu2 %v407_v46  ;;  %613 = vmatpush.msrb.mxu0 %v283_v47  ;;  %v308_v27 = vld [vmem:[#allocation5 + $0x150] sm:$0xff] }
  0x8e   : > { %633 = vmatpush.msrb.mxu1 %v347_v48  ;;  %674 = vmatpush.msrb.mxu3 %v471_v49  ;;  %v372_v28 = vld [vmem:[#allocation5 + $0x350] sm:$0xff] }
  0x8f   : > { %655 = vmatpush.msrb.mxu2 %v403_v50  ;;  %614 = vmatpush.msrb.mxu0 %v279_v51  ;;  %v428_v29 = vld [vmem:[#allocation5 + $0x510] sm:$0xff] }
  0x90   : > { %634 = vmatpush.msrb.mxu1 %v343_v52  ;;  %675 = vmatpush.msrb.mxu3 %v467_v53  ;;  %v496_v30 = vld [vmem:[#allocation5 + $0x730] sm:$0xff] }
  0x91   : > { %656 = vmatpush.msrb.mxu2 %v399_v54  ;;  %615 = vmatpush.msrb.mxu0 %v275_v55  ;;  %v304_v31 = vld [vmem:[#allocation5 + $0x130] sm:$0xff] }
  0x92   : > { %635 = vmatpush.msrb.mxu1 %v339_v56  ;;  %676 = vmatpush.msrb.mxu3 %v463_v57  ;;  %v368_v32 = vld [vmem:[#allocation5 + $0x330] sm:$0xff] }
  0x93   : > { %657 = vmatpush.msrb.mxu2 %v395_v58  ;;  %616 = vmatpush.msrb.mxu0 %v271_v59  ;;  %v424_v33 = vld [vmem:[#allocation5 + $0x4f0] sm:$0xff] }
  0x94   : > { %636 = vmatpush.msrb.mxu1 %v335_v61  ;;  %677 = vmatpush.msrb.mxu3 %v459_v63  ;;  %v492_v34 = vld [vmem:[#allocation5 + $0x710] sm:$0xff] }
  0x95   : > { %722 = vmatpush.msra.mxu2 %v456_v62  ;;  %598 = vmatmul.f32.vlgmr.msra.gmra.mxu3 %v1451_v0  ;;  %v300_v35 = vld [vmem:[#allocation5 + $0x110] sm:$0xff] }
  0x96   : > { %617 = vmatpush.msrb.mxu0 %v267_v1  ;;  %742 = vmatpush.msra.mxu3 %v520_v3  ;;  %v364_v36 = vld [vmem:[#allocation5 + $0x310] sm:$0xff]  ;;  %v457_v1 = vld [vmem:[#allocation5 + $0x5f8] sm:$0xff] }
  0x97   : > { %723 = vmatpush.msra.mxu2 %v452_v2  ;;  %637 = vmatpush.msrb.mxu1 %v331_v4  ;;  %v420_v37 = vld [vmem:[#allocation5 + $0x4d0] sm:$0xff] }
  0x98   : > { %538 = vmatmul.f32.vlgmr.msra.gmra.mxu0 %v1455_v5  ;;  %558 = vmatmul.f32.vlgmr.msra.gmra.mxu1 %v1459_v6  ;;  %v488_v38 = vld [vmem:[#allocation5 + $0x6f0] sm:$0xff] }
  0x99   : > { %682 = vmatpush.msra.mxu0 %v328_v7  ;;  %702 = vmatpush.msra.mxu1 %v392_v8  ;;  %v296_v39 = vld [vmem:[#allocation5 + $0xf0] sm:$0xff]  ;;  %v453_v7 = vld [vmem:[#allocation5 + $0x5d8] sm:$0xff] }
  0x9a   : > { %724 = vmatpush.msra.mxu2 %v448_v9  ;;  %743 = vmatpush.msra.mxu3 %v516_v10  ;;  %v360_v40 = vld [vmem:[#allocation5 + $0x2f0] sm:$0xff]  ;;  %v521_v8 = vld [vmem:[#allocation5 + $0x7f8] sm:$0xff] }
  0x9b   : > { %683 = vmatpush.msra.mxu0 %v324_v11  ;;  %703 = vmatpush.msra.mxu1 %v388_v12  ;;  %v416_v41 = vld [vmem:[#allocation5 + $0x4b0] sm:$0xff]  ;;  %v329_v11 = vld [vmem:[#allocation5 + $0x1f8] sm:$0xff] }
  0x9c   : > { %725 = vmatpush.msra.mxu2 %v444_v13  ;;  %744 = vmatpush.msra.mxu3 %v512_v14  ;;  %v484_v42 = vld [vmem:[#allocation5 + $0x6d0] sm:$0xff]  ;;  %v393_v12 = vld [vmem:[#allocation5 + $0x3f8] sm:$0xff] }
  0x9d   : > { %684 = vmatpush.msra.mxu0 %v320_v15  ;;  %704 = vmatpush.msra.mxu1 %v384_v16  ;;  %v292_v43 = vld [vmem:[#allocation5 + $0xd0] sm:$0xff]  ;;  %v449_v13 = vld [vmem:[#allocation5 + $0x5b8] sm:$0xff] }
  0x9e   : > { %726 = vmatpush.msra.mxu2 %v440_v17  ;;  %745 = vmatpush.msra.mxu3 %v508_v18  ;;  %v356_v44 = vld [vmem:[#allocation5 + $0x2d0] sm:$0xff]  ;;  %v517_v14 = vld [vmem:[#allocation5 + $0x7d8] sm:$0xff] }
  0x9f   : > { %685 = vmatpush.msra.mxu0 %v316_v19  ;;  %705 = vmatpush.msra.mxu1 %v380_v20  ;;  %v412_v45 = vld [vmem:[#allocation5 + $0x490] sm:$0xff]  ;;  %v325_v15 = vld [vmem:[#allocation5 + $0x1d8] sm:$0xff] }
  0xa0   : > { %727 = vmatpush.msra.mxu2 %v436_v21  ;;  %746 = vmatpush.msra.mxu3 %v504_v22  ;;  %v480_v46 = vld [vmem:[#allocation5 + $0x6b0] sm:$0xff]  ;;  %v389_v16 = vld [vmem:[#allocation5 + $0x3d8] sm:$0xff] }
  0xa1   : > { %686 = vmatpush.msra.mxu0 %v312_v23  ;;  %706 = vmatpush.msra.mxu1 %v376_v24  ;;  %v288_v47 = vld [vmem:[#allocation5 + $0xb0] sm:$0xff]  ;;  %v445_v17 = vld [vmem:[#allocation5 + $0x598] sm:$0xff] }
  0xa2   : > { %728 = vmatpush.msra.mxu2 %v432_v25  ;;  %747 = vmatpush.msra.mxu3 %v500_v26  ;;  %v352_v48 = vld [vmem:[#allocation5 + $0x2b0] sm:$0xff]  ;;  %v513_v18 = vld [vmem:[#allocation5 + $0x7b8] sm:$0xff] }
  0xa3   : > { %687 = vmatpush.msra.mxu0 %v308_v27  ;;  %707 = vmatpush.msra.mxu1 %v372_v28  ;;  %v408_v49 = vld [vmem:[#allocation5 + $0x470] sm:$0xff]  ;;  %v321_v19 = vld [vmem:[#allocation5 + $0x1b8] sm:$0xff] }
  0xa4   : > { %729 = vmatpush.msra.mxu2 %v428_v29  ;;  %748 = vmatpush.msra.mxu3 %v496_v30  ;;  %v476_v50 = vld [vmem:[#allocation5 + $0x690] sm:$0xff]  ;;  %v385_v20 = vld [vmem:[#allocation5 + $0x3b8] sm:$0xff] }
  0xa5   : > { %688 = vmatpush.msra.mxu0 %v304_v31  ;;  %708 = vmatpush.msra.mxu1 %v368_v32  ;;  %v284_v51 = vld [vmem:[#allocation5 + $0x90] sm:$0xff]  ;;  %v441_v21 = vld [vmem:[#allocation5 + $0x578] sm:$0xff] }
  0xa6   : > { %730 = vmatpush.msra.mxu2 %v424_v33  ;;  %749 = vmatpush.msra.mxu3 %v492_v34  ;;  %v348_v52 = vld [vmem:[#allocation5 + $0x290] sm:$0xff]  ;;  %v509_v22 = vld [vmem:[#allocation5 + $0x798] sm:$0xff] }
  0xa7   : > { %689 = vmatpush.msra.mxu0 %v300_v35  ;;  %709 = vmatpush.msra.mxu1 %v364_v36  ;;  %v404_v53 = vld [vmem:[#allocation5 + $0x450] sm:$0xff]  ;;  %v317_v23 = vld [vmem:[#allocation5 + $0x198] sm:$0xff] }
  0xa8   : > { %731 = vmatpush.msra.mxu2 %v420_v37  ;;  %750 = vmatpush.msra.mxu3 %v488_v38  ;;  %v472_v54 = vld [vmem:[#allocation5 + $0x670] sm:$0xff]  ;;  %v381_v24 = vld [vmem:[#allocation5 + $0x398] sm:$0xff] }
  0xa9   : > { %690 = vmatpush.msra.mxu0 %v296_v39  ;;  %710 = vmatpush.msra.mxu1 %v360_v40  ;;  %v280_v55 = vld [vmem:[#allocation5 + $0x70] sm:$0xff]  ;;  %v437_v25 = vld [vmem:[#allocation5 + $0x558] sm:$0xff] }
  0xaa   : > { %732 = vmatpush.msra.mxu2 %v416_v41  ;;  %751 = vmatpush.msra.mxu3 %v484_v42  ;;  %v344_v56 = vld [vmem:[#allocation5 + $0x270] sm:$0xff]  ;;  %v505_v26 = vld [vmem:[#allocation5 + $0x778] sm:$0xff] }
  0xab   : > { %691 = vmatpush.msra.mxu0 %v292_v43  ;;  %711 = vmatpush.msra.mxu1 %v356_v44  ;;  %v400_v57 = vld [vmem:[#allocation5 + $0x430] sm:$0xff]  ;;  %v313_v27 = vld [vmem:[#allocation5 + $0x178] sm:$0xff] }
  0xac   : > { %733 = vmatpush.msra.mxu2 %v412_v45  ;;  %752 = vmatpush.msra.mxu3 %v480_v46  ;;  %v468_v58 = vld [vmem:[#allocation5 + $0x650] sm:$0xff]  ;;  %v377_v28 = vld [vmem:[#allocation5 + $0x378] sm:$0xff] }
  0xad   : > { %692 = vmatpush.msra.mxu0 %v288_v47  ;;  %712 = vmatpush.msra.mxu1 %v352_v48  ;;  %v276_v59 = vld [vmem:[#allocation5 + $0x50] sm:$0xff]  ;;  %v433_v29 = vld [vmem:[#allocation5 + $0x538] sm:$0xff] }
  0xae   : > { %734 = vmatpush.msra.mxu2 %v408_v49  ;;  %753 = vmatpush.msra.mxu3 %v476_v50  ;;  %v340_v61 = vld [vmem:[#allocation5 + $0x250] sm:$0xff]  ;;  %v501_v30 = vld [vmem:[#allocation5 + $0x758] sm:$0xff] }
  0xaf   : > { %693 = vmatpush.msra.mxu0 %v284_v51  ;;  %713 = vmatpush.msra.mxu1 %v348_v52  ;;  %v396_v62 = vld [vmem:[#allocation5 + $0x410] sm:$0xff]  ;;  %v309_v31 = vld [vmem:[#allocation5 + $0x158] sm:$0xff] }
  0xb0   : > { %735 = vmatpush.msra.mxu2 %v404_v53  ;;  %754 = vmatpush.msra.mxu3 %v472_v54  ;;  %v464_v63 = vld [vmem:[#allocation5 + $0x630] sm:$0xff]  ;;  %v373_v32 = vld [vmem:[#allocation5 + $0x358] sm:$0xff] }
  0xb1   : > { %694 = vmatpush.msra.mxu0 %v280_v55  ;;  %714 = vmatpush.msra.mxu1 %v344_v56  ;;  %v272_v2 = vld [vmem:[#allocation5 + $0x30] sm:$0xff]  ;;  %v429_v33 = vld [vmem:[#allocation5 + $0x518] sm:$0xff] }
  0xb2   : > { %736 = vmatpush.msra.mxu2 %v400_v57  ;;  %755 = vmatpush.msra.mxu3 %v468_v58  ;;  %v336_v3 = vld [vmem:[#allocation5 + $0x230] sm:$0xff]  ;;  %v497_v34 = vld [vmem:[#allocation5 + $0x738] sm:$0xff] }
  0xb3   : > { %695 = vmatpush.msra.mxu0 %v276_v59  ;;  %715 = vmatpush.msra.mxu1 %v340_v61  ;;  %v460_v4 = vld [vmem:[#allocation5 + $0x610] sm:$0xff]  ;;  %v305_v35 = vld [vmem:[#allocation5 + $0x138] sm:$0xff] }
  0xb4   : > { %737 = vmatpush.msra.mxu2 %v396_v62  ;;  %756 = vmatpush.msra.mxu3 %v464_v63  ;;  %v268_v9 = vld [vmem:[#allocation5 + $0x10] sm:$0xff]  ;;  %v369_v36 = vld [vmem:[#allocation5 + $0x338] sm:$0xff] }
  0xb5   : > { %658 = vmatmul.f32.vlgmr.msrb.gmra.mxu2 %v1448_v60  ;;  %696 = vmatpush.msra.mxu0 %v272_v2  ;;  %v332_v10 = vld [vmem:[#allocation5 + $0x210] sm:$0xff]  ;;  %v425_v37 = vld [vmem:[#allocation5 + $0x4f8] sm:$0xff] }
  0xb6   : > { %802 = vmatpush.msrb.mxu2 %v457_v1  ;;  %716 = vmatpush.msra.mxu1 %v336_v3  ;;  %v493_v38 = vld [vmem:[#allocation5 + $0x718] sm:$0xff] }
  0xb7   : > { %757 = vmatpush.msra.mxu3 %v460_v4  ;;  %697 = vmatpush.msra.mxu0 %v268_v9  ;;  %v301_v39 = vld [vmem:[#allocation5 + $0x118] sm:$0xff] }
  0xb8   : > { %678 = vmatmul.f32.vlgmr.msrb.gmra.mxu3 %v1451_v0  ;;  %803 = vmatpush.msrb.mxu2 %v453_v7  ;;  %v365_v40 = vld [vmem:[#allocation5 + $0x318] sm:$0xff] }
  0xb9   : > { %822 = vmatpush.msrb.mxu3 %v521_v8  ;;  %717 = vmatpush.msra.mxu1 %v332_v10  ;;  %v421_v41 = vld [vmem:[#allocation5 + $0x4d8] sm:$0xff] }
  0xba   : > { %618 = vmatmul.f32.vlgmr.msrb.gmra.mxu0 %v1455_v5  ;;  %638 = vmatmul.f32.vlgmr.msrb.gmra.mxu1 %v1459_v6  ;;  %v489_v42 = vld [vmem:[#allocation5 + $0x6f8] sm:$0xff] }
  0xbb   : > { %762 = vmatpush.msrb.mxu0 %v329_v11  ;;  %782 = vmatpush.msrb.mxu1 %v393_v12  ;;  %v297_v43 = vld [vmem:[#allocation5 + $0xf8] sm:$0xff] }
  0xbc   : > { %804 = vmatpush.msrb.mxu2 %v449_v13  ;;  %823 = vmatpush.msrb.mxu3 %v517_v14  ;;  %v361_v44 = vld [vmem:[#allocation5 + $0x2f8] sm:$0xff]  ;;  %v842_v14 = vld [vmem:[#allocation7] sm:$0xf] }
  0xbd   : > { %763 = vmatpush.msrb.mxu0 %v325_v15  ;;  %783 = vmatpush.msrb.mxu1 %v389_v16  ;;  %v417_v45 = vld [vmem:[#allocation5 + $0x4b8] sm:$0xff] }
  0xbe   : > { %805 = vmatpush.msrb.mxu2 %v445_v17  ;;  %824 = vmatpush.msrb.mxu3 %v513_v18  ;;  %v485_v46 = vld [vmem:[#allocation5 + $0x6d8] sm:$0xff] }
  0xbf   : > { %764 = vmatpush.msrb.mxu0 %v321_v19  ;;  %784 = vmatpush.msrb.mxu1 %v385_v20  ;;  %v293_v47 = vld [vmem:[#allocation5 + $0xd8] sm:$0xff]  ;;  %v844_v19 = vperm.slane %v842_v14, 0 }
  0xc0   : > { %806 = vmatpush.msrb.mxu2 %v441_v21  ;;  %825 = vmatpush.msrb.mxu3 %v509_v22  ;;  %v357_v48 = vld [vmem:[#allocation5 + $0x2d8] sm:$0xff] }
  0xc1   : > { %765 = vmatpush.msrb.mxu0 %v317_v23  ;;  %785 = vmatpush.msrb.mxu1 %v381_v24  ;;  %v413_v49 = vld [vmem:[#allocation5 + $0x498] sm:$0xff] }
  0xc2   : > { %807 = vmatpush.msrb.mxu2 %v437_v25  ;;  %826 = vmatpush.msrb.mxu3 %v505_v26  ;;  %v481_v50 = vld [vmem:[#allocation5 + $0x6b8] sm:$0xff] }
  0xc3   : > { %766 = vmatpush.msrb.mxu0 %v313_v27  ;;  %786 = vmatpush.msrb.mxu1 %v377_v28  ;;  %v289_v51 = vld [vmem:[#allocation5 + $0xb8] sm:$0xff]  ;;  %v845_v28 = vperm.slane %v842_v14, 1 }
  0xc4   : > { %808 = vmatpush.msrb.mxu2 %v433_v29  ;;  %827 = vmatpush.msrb.mxu3 %v501_v30  ;;  %v353_v52 = vld [vmem:[#allocation5 + $0x2b8] sm:$0xff] }
  0xc5   : > { %767 = vmatpush.msrb.mxu0 %v309_v31  ;;  %787 = vmatpush.msrb.mxu1 %v373_v32  ;;  %v409_v53 = vld [vmem:[#allocation5 + $0x478] sm:$0xff] }
  0xc6   : > { %809 = vmatpush.msrb.mxu2 %v429_v33  ;;  %828 = vmatpush.msrb.mxu3 %v497_v34  ;;  %v477_v54 = vld [vmem:[#allocation5 + $0x698] sm:$0xff] }
  0xc7   : > { %768 = vmatpush.msrb.mxu0 %v305_v35  ;;  %788 = vmatpush.msrb.mxu1 %v369_v36  ;;  %v285_v55 = vld [vmem:[#allocation5 + $0x98] sm:$0xff] }
  0xc8   : > { %810 = vmatpush.msrb.mxu2 %v425_v37  ;;  %829 = vmatpush.msrb.mxu3 %v493_v38  ;;  %v349_v56 = vld [vmem:[#allocation5 + $0x298] sm:$0xff] }
  0xc9   : > { %769 = vmatpush.msrb.mxu0 %v301_v39  ;;  %789 = vmatpush.msrb.mxu1 %v365_v40  ;;  %v405_v57 = vld [vmem:[#allocation5 + $0x458] sm:$0xff]  ;;  %v846_v40 = vperm.slane %v842_v14, 2 }
  0xca   : > { %811 = vmatpush.msrb.mxu2 %v421_v41  ;;  %830 = vmatpush.msrb.mxu3 %v489_v42  ;;  %v473_v58 = vld [vmem:[#allocation5 + $0x678] sm:$0xff] }
  0xcb   : > { %770 = vmatpush.msrb.mxu0 %v297_v43  ;;  %790 = vmatpush.msrb.mxu1 %v361_v44  ;;  %v281_v59 = vld [vmem:[#allocation5 + $0x78] sm:$0xff] }
  0xcc   : > { %812 = vmatpush.msrb.mxu2 %v417_v45  ;;  %831 = vmatpush.msrb.mxu3 %v485_v46  ;;  %v345_v61 = vld [vmem:[#allocation5 + $0x278] sm:$0xff] }
  0xcd   : > { %771 = vmatpush.msrb.mxu0 %v293_v47  ;;  %791 = vmatpush.msrb.mxu1 %v357_v48  ;;  %v401_v62 = vld [vmem:[#allocation5 + $0x438] sm:$0xff] }
  0xce   : > { %813 = vmatpush.msrb.mxu2 %v413_v49  ;;  %832 = vmatpush.msrb.mxu3 %v481_v50  ;;  %v469_v63 = vld [vmem:[#allocation5 + $0x658] sm:$0xff] }
  0xcf   : > { %738 = vmatmul.f32.vlgmr.msra.gmra.mxu2 %v1448_v60  ;;  %772 = vmatpush.msrb.mxu0 %v289_v51  ;;  %v277_v1 = vld [vmem:[#allocation5 + $0x58] sm:$0xff]  ;;  %v847_v51 = vperm.slane %v842_v14, 3 }
  0xd0   : > { %792 = vmatpush.msrb.mxu1 %v353_v52  ;;  %814 = vmatpush.msrb.mxu2 %v409_v53  ;;  %v341_v2 = vld [vmem:[#allocation5 + $0x258] sm:$0xff] }
  0xd1   : > { %833 = vmatpush.msrb.mxu3 %v477_v54  ;;  %773 = vmatpush.msrb.mxu0 %v285_v55  ;;  %v397_v3 = vld [vmem:[#allocation5 + $0x418] sm:$0xff] }
  0xd2   : > { %758 = vmatmul.f32.vlgmr.msra.gmra.mxu3 %v1451_v0  ;;  %793 = vmatpush.msrb.mxu1 %v349_v56  ;;  %v465_v4 = vld [vmem:[#allocation5 + $0x638] sm:$0xff] }
  0xd3   : > { %815 = vmatpush.msrb.mxu2 %v405_v57  ;;  %834 = vmatpush.msrb.mxu3 %v473_v58  ;;  %v273_v7 = vld [vmem:[#allocation5 + $0x38] sm:$0xff] }
  0xd4   : > { %698 = vmatmul.f32.vlgmr.msra.gmra.mxu0 %v1455_v5  ;;  %718 = vmatmul.f32.vlgmr.msra.gmra.mxu1 %v1459_v6  ;;  %v337_v8 = vld [vmem:[#allocation5 + $0x238] sm:$0xff] }
  0xd5   : > { %774 = vmatpush.msrb.mxu0 %v281_v59  ;;  %794 = vmatpush.msrb.mxu1 %v345_v61  ;;  %v461_v9 = vld [vmem:[#allocation5 + $0x618] sm:$0xff] }
  0xd6   : > { %816 = vmatpush.msrb.mxu2 %v401_v62  ;;  %835 = vmatpush.msrb.mxu3 %v469_v63  ;;  %v269_v10 = vld [vmem:[#allocation5 + $0x18] sm:$0xff] }
  0xd7   : > { %775 = vmatpush.msrb.mxu0 %v277_v1  ;;  %795 = vmatpush.msrb.mxu1 %v341_v2  ;;  %v333_v11 = vld [vmem:[#allocation5 + $0x218] sm:$0xff] }
  0xd8   : > { %817 = vmatpush.msrb.mxu2 %v397_v3  ;;  %836 = vmatpush.msrb.mxu3 %v465_v4 }
  0xd9   : > { %818 = vmatmul.f32.vlgmr.msrb.gmra.mxu2 %v1448_v60  ;;  %776 = vmatpush.msrb.mxu0 %v273_v7  ;;  %v856_v60 = vld [vmem:[#allocation8] sm:$0xf] }
  0xda   : > { %796 = vmatpush.msrb.mxu1 %v337_v8  ;;  %837 = vmatpush.msrb.mxu3 %v461_v9  ;;  %v858_v21 = vperm.slane %v856_v60, 0  ;;  %v859_v30 = vperm.slane %v856_v60, 1  ;;  %v860_v42 = vperm.slane %v856_v60, 2  ;;  %v861_v54 = vperm.slane %v856_v60, 3 }
  0xdb   : > { %838 = vmatmul.f32.vlgmr.msrb.gmra.mxu3 %v1451_v0  ;;  %777 = vmatpush.msrb.mxu0 %v269_v10 }
  0xdc   : > { %797 = vmatpush.msrb.mxu1 %v333_v11  ;;  %778 = vmatmul.f32.vlgmr.msrb.gmra.mxu0 %v1455_v5 }
  0xdd   : > { %798 = vmatmul.f32.vlgmr.msrb.gmra.mxu1 %v1459_v6 }
  0xf7   : > { %v579_v16 = vpop.f32.mrf.mxu2 }
 0x115   : > { %v539_v12 = vpop.f32.mrf.mxu0  ;;  %v559_v13 = vpop.f32.mrf.mxu1 }
 0x116   : > { %v560_v15 = vadd.f32 %v559_v13, %v539_v12 }
 0x118   : > { %v580_v17 = vadd.f32 %v579_v16, %v560_v15  ;;  %v599_v18 = vpop.f32.mrf.mxu3 }
 0x11a   : > { %v600_v20 = vadd.f32 %v599_v18, %v580_v17 }
 0x11c   : > { %v852_v22 = vmul.f32 %v844_v19, %v600_v20 }
 0x11e   : > { %v866_v0 = vadd.f32 %v858_v21, %v852_v22 }
 0x120   : > { %v870_v23 = vmax.f32 %v866_v0, 0.0 }
 0x122   : > { %874 = vst [vmem:[%s1477_s23] sm:$0xff] %v870_v23 }
 0x137   : > { %v619_v5 = vpop.f32.mrf.mxu0  ;;  %v639_v6 = vpop.f32.mrf.mxu1 }
 0x138   : > { %v659_v24 = vpop.f32.mrf.mxu2  ;;  %v640_v25 = vadd.f32 %v639_v6, %v619_v5 }
 0x13a   : > { %v660_v26 = vadd.f32 %v659_v24, %v640_v25 }
 0x13b   : > { %v679_v27 = vpop.f32.mrf.mxu3 }
 0x13c   : > { %v680_v29 = vadd.f32 %v679_v27, %v660_v26 }
 0x13e   : > { %v853_v31 = vmul.f32 %v845_v28, %v680_v29 }
 0x140   : > { %v867_v32 = vadd.f32 %v859_v30, %v853_v31 }
 0x142   : > { %v871_v33 = vmax.f32 %v867_v32, 0.0 }
 0x144   : > { %875 = vst [vmem:[%s1477_s23 + $0x8] sm:$0xff] %v871_v33 }
 0x151   : > { %v699_v34 = vpop.f32.mrf.mxu0  ;;  %v719_v35 = vpop.f32.mrf.mxu1 }
 0x152   : > { %v739_v36 = vpop.f32.mrf.mxu2  ;;  %v720_v37 = vadd.f32 %v719_v35, %v699_v34 }
 0x154   : > { %v740_v38 = vadd.f32 %v739_v36, %v720_v37 }
 0x155   : > { %v759_v39 = vpop.f32.mrf.mxu3 }
 0x156   : > { %v760_v41 = vadd.f32 %v759_v39, %v740_v38 }
 0x158   : > { %v854_v43 = vmul.f32 %v846_v40, %v760_v41 }
 0x159   : > { %v779_v44 = vpop.f32.mrf.mxu0 }
 0x15a   : > { %v868_v45 = vadd.f32 %v860_v42, %v854_v43  ;;  %v799_v46 = vpop.f32.mrf.mxu1 }
 0x15b   : > { %v800_v47 = vadd.f32 %v799_v46, %v779_v44 }
 0x15c   : > { %v819_v48 = vpop.f32.mrf.mxu2  ;;  %v872_v49 = vmax.f32 %v868_v45, 0.0 }
 0x15d   : > { %v820_v50 = vadd.f32 %v819_v48, %v800_v47 }
 0x15e   : > { %876 = vst [vmem:[%s1477_s23 + $0x10] sm:$0xff] %v872_v49  ;;  %v839_v52 = vpop.f32.mrf.mxu3 }
 0x15f   : > { %v840_v53 = vadd.f32 %v839_v52, %v820_v50 }
 0x161   : > { %v855_v55 = vmul.f32 %v847_v51, %v840_v53 }
 0x163   : > { %v869_v56 = vadd.f32 %v861_v54, %v855_v55 }
 0x165   : > { %v873_v57 = vmax.f32 %v869_v56, 0.0 }
 0x167   : > { %877 = vst [vmem:[%s1477_s23 + $0x18] sm:$0xff] %v873_v57 }
 0x168   : > { %1242 = shalt.err (!%p1239_p8)
}
 0x169   : > { %1030 = dma.vmem_to_hbm [thread:$0]  (%p1396_p12), %s893_s11, 512, %s895_s12, %s879_s22  }
 0x16a PF: > { %p1057_p9 = scmp.ge.s32.totalorder %s1289_s18, 2  ;;  %s906_s26 = sand.u32 1, %s1277_s15  }
 0x16b   : > { %s907_s6 = scalar_lea.sflag [#allocation4], %s906_s26 }
 0x16c   : > { %p1047_p10 = pnand %p1057_p9, %p1401_p2 }
 0x16e   : > { %p1048_p13 = pneg %p1047_p10 }
 0x170   : > { %1272 = dma.done.wait (%p1048_p13), %s907_s6, 512  }
 0x171   : > { %1274 = vsyncadd (%p1048_p13), %s907_s6, 4294966784  ;;  %p19_p0 = scmp.ge.s32.totalorder %s1376_s14, 6   ;;  %s1527_s15 = smov %s1281_s16 }
 0x172   : > { %s1528_s16 = smov %s1285_s17  ;;  %s1529_s17 = smov %s1388_s21 }
 0x173   : > { %s1530_s18 = smov %s1376_s14  ;;  %21 = sbr.rel (!%p19_p0) target bundleno = 7 (0x7), region = 93 }
 0x178   :  { %913 = vsyncpa [#allocation3], 1 }
 0x179   :  { %915 = vsyncpa [#allocation3 + $0x1], 1 }
 0x17a   :  { %916 = vsyncpa [#allocation6], 1 }
 0x17b   :  { %917 = vsyncpa [#allocation9], 1 }
 0x17c   :  { %918 = vsyncpa [#allocation4], 1 }
 0x17d   :  { %920 = vsyncpa [#allocation4 + $0x1], 1 }

</bundles_post_ra>
